<compile_context>
chip_gen: v7x
topology: tpu7x:2x2x1
jax: 0.10.0
libtpu: 0.0.40
codegen_flags: <defaults>
</compile_context>

<pallas_src>
import numpy as np
import jax
import jax.numpy as jnp
from jax.experimental import pallas as pl
from jax.experimental.pallas import tpu as pltpu


_TAPS = tuple((kh - 1, kw - 1) for kh in range(3) for kw in range(3))


# --------------------------------------------------------------------------- host-side
def _bilinear_matrix(out_size: int, in_size: int) -> np.ndarray:
    """M (out,in) with M @ v == F.interpolate(v, mode=bilinear, align_corners=True)."""
    if in_size == 1:
        return np.ones((out_size, 1), np.float32)
    o = np.arange(out_size, dtype=np.float64)
    src = o * (in_size - 1) / (out_size - 1)
    i0 = np.clip(np.floor(src).astype(np.int64), 0, in_size - 2)
    frac = src - i0
    M = np.zeros((out_size, in_size), np.float64)
    M[np.arange(out_size), i0] += 1.0 - frac
    M[np.arange(out_size), i0 + 1] += frac
    return M.astype(np.float32)


def _upsample_matrix(Hin, Win, H, W) -> np.ndarray:
    """U s.t. x_flat(C, Hin*Win) @ U == upsampled(C, H*W); U[hi*Win+wi, h*W+w]."""
    Mh = _bilinear_matrix(H, Hin)
    Mw = _bilinear_matrix(W, Win)
    return np.kron(Mh, Mw).T.astype(np.float32)          # (Hin*Win, H*W)


def _tap_masks(N, H, W) -> np.ndarray:
    """(9, N*H*W) 0/1 lane masks implementing conv zero-padding for each 3x3 tap."""
    hh, ww = np.meshgrid(np.arange(H), np.arange(W), indexing="ij")
    m = np.zeros((9, H * W), np.float32)
    for t, (dh, dw) in enumerate(_TAPS):
        valid = (hh + dh >= 0) & (hh + dh < H) & (ww + dw >= 0) & (ww + dw < W)
        m[t] = valid.reshape(-1).astype(np.float32)
    return np.tile(m, (1, N))      # same mask for every sample block along the lane axis


def _conv_matrix(w, Cout) -> np.ndarray:
    """HWIO (k,k,Ci,Co), k in {1,3} -> (Co, 9*Ci), contraction ordered (tap, ci).
    A 1x1 conv (pad 0) is embedded at the centre tap of a 3x3 (pad 1) — equivalent."""
    k, _, Ci, Co = w.shape
    assert Co == Cout
    w33 = np.zeros((3, 3, Ci, Co), np.float32)
    off = (3 - k) // 2
    w33[off:off + k, off:off + k] = np.asarray(w, np.float32)
    return w33.transpose(3, 0, 1, 2).reshape(Co, 9 * Ci)


# Defensive one-time probe of pltpu.roll's rotation direction (the kernel only
# depends on the shift pattern and this sign).
_ROLL_LIKE_JNP = None


def _roll_like_jnp() -> bool:
    global _ROLL_LIKE_JNP
    if _ROLL_LIKE_JNP is None:
        def k(x_ref, o_ref):
            o_ref[...] = pltpu.roll(x_ref[...], shift=1, axis=1)
        x = jnp.arange(8 * 128, dtype=jnp.float32).reshape(8, 128)
        y = pl.pallas_call(k, out_shape=jax.ShapeDtypeStruct((8, 128), jnp.float32))(x)
        _ROLL_LIKE_JNP = bool(y[0, 1] == 0.0)   # jnp.roll convention: elem 0 -> index 1
    return _ROLL_LIKE_JNP


# --------------------------------------------------------------------------- kernel
def _make_kernel(N, H, W, Cin, Cout, *, roll_like_jnp, eps=1e-5):
    HW = H * W
    NHW = N * HW
    inv_cnt = 1.0 / float(NHW)

    def _bn(y, g_ref, b_ref):
        # single-pass training-mode BatchNorm2d: per-channel (= per-row) batch stats,
        # gamma folded into one scale, beta/mean folded into one shift.
        s1 = jnp.sum(y, axis=1, keepdims=True)
        s2 = jnp.sum(y * y, axis=1, keepdims=True)
        mean = s1 * inv_cnt
        var = s2 * inv_cnt - mean * mean
        scale = g_ref[...] * jax.lax.rsqrt(var + eps)
        return y * scale + (b_ref[...] - mean * scale)

    def _im2col(src, c, p_ref, masks):
        # src: (c, N*H*W) value.  Writes the (9*c, N*H*W) im2col patch matrix into
        # p_ref: tap shift = lane roll (XLU, cheap), conv zero-padding = lane mask.
        # Cross-sample / cross-row bleed of the flat roll is exactly the masked set.
        for t, (dh, dw) in enumerate(_TAPS):
            s = dh * W + dw
            if s == 0:
                patch = src                               # centre tap: no shift, mask==1
            else:
                shift = (-s) % NHW if roll_like_jnp else s % NHW
                patch = pltpu.roll(src, shift=shift, axis=1) * masks[t:t + 1, :]
            p_ref[t * c:(t + 1) * c, :] = patch           # full-lane-width store

    def kernel(x_ref, u_ref, m_ref, wc_ref, w2_ref,
               g1r_ref, b1r_ref, g2_ref, b2_ref, o_ref, xu_ref, p_ref):
        # ---- fused bilinear upsample (align_corners=True): one small f32 matmul
        #      per sample, laid out channels-on-rows / (n, h*w) on lanes.
        u = u_ref[...]
        for n in range(N):
            xu_ref[:, n * HW:(n + 1) * HW] = jnp.dot(
                x_ref[n * Cin:(n + 1) * Cin, :], u,
                preferred_element_type=jnp.float32)
        xu = xu_ref[...]                                  # (Cin, N*H*W) f32
        masks = m_ref[...]                                # (9,   N*H*W) f32

        # ---- conv1 (3x3, pad 1) + residual conv share ONE im2col bf16 matmul.
        _im2col(xu, Cin, p_ref, masks)
        y1 = jnp.dot(wc_ref[...],                         # (2*Cout, 9*Cin) bf16
                     p_ref[0:9 * Cin, :].astype(jnp.bfloat16),
                     preferred_element_type=jnp.float32)  # (2*Cout, N*H*W) f32
        y1 = _bn(y1, g1r_ref, b1r_ref)                    # rows: [conv1 | residual]
        t = jnp.maximum(y1[0:Cout, :], 0.0)               # relu(bn1(conv1(x_up)))
        res = y1[Cout:2 * Cout, :]                        # bn_r(conv_r(x_up)), no relu

        # ---- conv2 (3x3, pad 1) -> bn2, add residual, relu.
        _im2col(t, Cout, p_ref, masks)
        y2 = jnp.dot(w2_ref[...],                         # (Cout, 9*Cout) bf16
                     p_ref[0:9 * Cout, :].astype(jnp.bfloat16),
                     preferred_element_type=jnp.float32)
        y2 = _bn(y2, g2_ref, b2_ref)

        out = jnp.maximum(y2 + res, 0.0)                  # (Cout, N*H*W)
        for n in range(N):                                # lane-dense NCHW-flat stores
            o_ref[n, :, :] = out[:, n * HW:(n + 1) * HW]

    return kernel


# --------------------------------------------------------------------------- wrapper
def upsample_basic_block_nchw(x_nchw, params, *, scale=2, eps=1e-5):
    """UpsampleBasicBlock forward. x_nchw: (N, Cin, Hin, Win) -> (N, Cout, H, W)."""
    w1, g1, b1, w2, g2, b2, wr, gr, br = params
    N, Cin, Hin, Win = x_nchw.shape
    Cout = w1.shape[-1]
    H, W = Hin * scale, Win * scale
    HW, NHW = H * W, N * H * W

    # host-side constants (tiny): interpolation matrix, tap masks, packed weights
    u = jnp.asarray(_upsample_matrix(Hin, Win, H, W))                # (Hin*Win, H*W) f32
    masks = jnp.asarray(_tap_masks(N, H, W))                         # (9, N*H*W)    f32
    wc = jnp.asarray(np.concatenate([_conv_matrix(w1, Cout),
                                     _conv_matrix(wr, Cout)], axis=0),
                     dtype=jnp.bfloat16)                             # (2*Cout, 9*Cin)
    w2m = jnp.asarray(_conv_matrix(w2, Cout), dtype=jnp.bfloat16)    # (Cout, 9*Cout)

    g1r = jnp.concatenate([g1, gr]).reshape(2 * Cout, 1).astype(jnp.float32)
    b1r = jnp.concatenate([b1, br]).reshape(2 * Cout, 1).astype(jnp.float32)
    g2v = jnp.reshape(g2, (Cout, 1)).astype(jnp.float32)
    b2v = jnp.reshape(b2, (Cout, 1)).astype(jnp.float32)

    # NCHW -> (N*Cin, Hin*Win): a free, contiguous reshape (no transpose / HBM pass).
    x2 = jnp.reshape(x_nchw, (N * Cin, Hin * Win)).astype(jnp.float32)

    args = (x2, u, masks, wc, w2m, g1r, b1r, g2v, b2v)

    def full_spec(a):
        nd = a.ndim
        return pl.BlockSpec(a.shape, lambda i, _nd=nd: (0,) * _nd)

    out = pl.pallas_call(
        _make_kernel(N, H, W, Cin, Cout,
                     roll_like_jnp=_roll_like_jnp(), eps=eps),
        out_shape=jax.ShapeDtypeStruct((N, Cout, HW), jnp.float32),
        grid=(1,),
        in_specs=[full_spec(a) for a in args],
        out_specs=pl.BlockSpec((N, Cout, HW), lambda i: (0, 0, 0)),
        scratch_shapes=[
            pltpu.VMEM((Cin, NHW), jnp.float32),                  # upsampled input
            pltpu.VMEM((9 * max(Cin, Cout), NHW), jnp.float32),   # im2col patch matrix
        ],
        # TODO(synk): for production shapes, tile H over a "parallel" grid axis
        # (v7x megacore / 64 MiB VMEM) with a two-pass cross-tile BatchNorm reduction.
        compiler_params=pltpu.CompilerParams(
            dimension_semantics=("arbitrary",),
            vmem_limit_bytes=64 * 1024 * 1024),
    )(*args)

    # (N, Cout, H*W) -> (N, Cout, H, W): contiguous reshape only, no transpose.
    return jnp.reshape(out, (N, Cout, H, W))


# --------------------------------------------------------------------------- reference
def _bilinear_upsample_nhwc_ref(x_nhwc, scale):
    n, h, w, c = x_nhwc.shape
    mh = jnp.asarray(_bilinear_matrix(h * scale, h))
    mw = jnp.asarray(_bilinear_matrix(w * scale, w))
    y = jnp.einsum("oh,nhwc->nowc", mh, x_nhwc)
    return jnp.einsum("pw,nowc->nopc", mw, y)


def reference_nchw(x_nchw, params, *, scale=2, eps=1e-5):
    """Plain-JAX f32 reference of the block, NCHW in/out."""
    w1, g1, b1, w2, g2, b2, wr, gr, br = params
    x = jnp.transpose(x_nchw, (0, 2, 3, 1)).astype(jnp.float32)
    x = _bilinear_upsample_nhwc_ref(x, scale)

    def conv(a, w, pad):
        return jax.lax.conv_general_dilated(
            a, w, (1, 1), [(pad, pad), (pad, pad)],
            dimension_numbers=("NHWC", "HWIO", "NHWC"))

    def bn(a, g, b):
        mean = a.mean(axis=(0, 1, 2), keepdims=True)
        var = jnp.square(a - mean).mean(axis=(0, 1, 2), keepdims=True)
        return ((a - mean) * jax.lax.rsqrt(var + eps)
                * g.reshape(1, 1, 1, -1) + b.reshape(1, 1, 1, -1))

    t = jnp.maximum(bn(conv(x, w1, 1), g1, b1), 0.0)
    out = bn(conv(t, w2, 1), g2, b2)
    kr = wr.shape[0]
    res = bn(conv(x, wr, (kr - 1) // 2), gr, br)
    out = jnp.maximum(out + res, 0.0)
    return jnp.transpose(out, (0, 3, 1, 2))


if __name__ == "__main__":
    key = jax.random.PRNGKey(0)
    N, inplanes, planes, Hin, Win = 2, 4, 8, 8, 8   # inplanes != planes -> 1x1 residual
    k1, k2, k3, kx = jax.random.split(key, 4)

    # Deterministic synthetic parameters (HWIO conv weights; BN at PyTorch defaults).
    w1 = 0.2 * jax.random.normal(k1, (3, 3, inplanes, planes), jnp.float32)
    w2 = 0.2 * jax.random.normal(k2, (3, 3, planes, planes), jnp.float32)
    wr = 0.2 * jax.random.normal(k3, (1, 1, inplanes, planes), jnp.float32)
    g1 = jnp.ones((planes,), jnp.float32); b1 = jnp.zeros((planes,), jnp.float32)
    g2 = jnp.ones((planes,), jnp.float32); b2 = jnp.zeros((planes,), jnp.float32)
    gr = jnp.ones((planes,), jnp.float32); br = jnp.zeros((planes,), jnp.float32)
    params = (w1, g1, b1, w2, g2, b2, wr, gr, br)

    x = jax.random.normal(kx, (N, inplanes, Hin, Win), jnp.float32)   # NCHW, like PyTorch

    out = upsample_basic_block_nchw(x, params, scale=2)
    out = jax.block_until_ready(out)

    ref = reference_nchw(x, params, scale=2)
    # Conv matmuls use bf16 MXU operands with f32 accumulation (per perf review);
    # vs. the all-f32 reference this gives |diff| on the order of 1e-2.
    if not jnp.allclose(out, ref, atol=5e-2, rtol=5e-2):
        raise AssertionError(
            "kernel/reference mismatch, max abs diff = "
            f"{float(jnp.max(jnp.abs(out - ref)))}")

    print("KERNEL_OK")
</pallas_src>

<mosaic_0001>
module attributes {stable_mosaic.version = 11 : i64} {
  func.func @k(%arg0: memref<8x128xf32, #tpu.memory_space<vmem>>, %arg1: memref<8x128xf32, #tpu.memory_space<vmem>>) attributes {dimension_semantics = [], scalar_prefetch = 0 : i64, scratch_operands = 0 : i64, tpu.core_type = #tpu.core_type<tc>} {
    %c0 = arith.constant 0 : index
    %c0_0 = arith.constant 0 : index
    %0 = vector.load %arg0[%c0, %c0_0] : memref<8x128xf32, #tpu.memory_space<vmem>>, vector<8x128xf32>
    %c1_i32 = arith.constant 1 : i32
    %1 = tpu.dynamic_rotate %0 by %c1_i32 dim 1 : vector<8x128xf32>, i32 -> vector<8x128xf32>
    %c0_1 = arith.constant 0 : index
    %c0_2 = arith.constant 0 : index
    %2 = vector.load %arg1[%c0_1, %c0_2] : memref<8x128xf32, #tpu.memory_space<vmem>>, vector<8x128xf32>
    tpu.vector_store %arg1[%c0_1, %c0_2], %1 {strides = array<i32>} : memref<8x128xf32, #tpu.memory_space<vmem>>, vector<8x128xf32>,
    return
  }
}

</mosaic_0001>

<bundles_post_ra>
// kernel: tpu_custom_call.1
= control target key start
LH: loop header
LB: loop body
LE: loop exit
PB: predicated region body
PF: predicated region fallthrough
CT: control target
= control target key end

     0   :  { %6 = vsyncpa [#allocation3], 0  ;;  %s128_s0 = inlined_call_operand.hbm [shape: f32[8,128], index: 0, kind: input, shape index: {}]   ;;  %s129_s1 = inlined_call_operand.hbm [shape: f32[8,128], index: 1, kind: output, shape index: {}]  }
   0x1   :  { %7 = vsyncpa [#allocation4], 0  ;;  %s91_s6 = smov [#allocation2]   ;;  %s43_s10 = scalar_lea.hbm %s128_s0, 128 }
   0x2   :  { %s14_s7 = sshll.u32 %s91_s6, 4  ;;  %p44_p0 = scmp.ne.s32.totalorder %s128_s0, %s43_s10  ;;  %s15_s7 = int_to_ptr.vmem [resolvable:$true] %s14_s7 }
   0x3   :  { %p47_p1 = scmp.lt.u32.totalorder %s43_s10, %s128_s0 }
   0x5   :  { %p49_p2 = pnand %p47_p1, %p44_p0 }
   0x7   :  { %52 = shalt.err (!%p49_p2)
}
   0x8   :  { %s53_s15 = scalar_lea.vmem %s15_s7, 128  ;;  %p58_p4 = scmp.lt.s32.totalorder %s15_s7, %s15_s7 }
   0x9   :  { %p54_p3 = scmp.ne.s32.totalorder %s15_s7, %s53_s15  ;;  %p59_p5 = scmp.lt.s32.totalorder %s53_s15, %s53_s15 }
   0xb   :  { %p60_p6 = por %p59_p5, %p58_p4 }
   0xd   :  { %p61_p7 = pnand %p60_p6, %p54_p3 }
   0xf   :  { %64 = shalt.err (!%p61_p7)
}
  0x10   :  { %17 = dma.hbm_to_vmem [thread:$0]  %s128_s0, 128, %s15_s7, [#allocation3]  }
  0x11   :  { %87 = dma.done.wait [#allocation3], 128  }
  0x12   :  { %88 = vsyncadd [#allocation3], 4294967168  ;;  %v21_v0 = vld [vmem:[#allocation2] sm:$0xff]  ;;  %s92_s18 = smov 1   ;;  %s93_s19 = smov [#allocation5]  }
  0x13   :  { %22 = vrot.lane.b32.xlu0 %v21_v0, %s92_s18  ;;  %s31_s20 = sshll.u32 %s93_s19, 4  ;;  %s32_s20 = int_to_ptr.vmem [resolvable:$true] %s31_s20 }
  0x14   :  { %s65_s21 = scalar_lea.vmem %s32_s20, 128  ;;  %p70_p9 = scmp.lt.s32.totalorder %s32_s20, %s32_s20 }
  0x15   :  { %p66_p8 = scmp.ne.s32.totalorder %s32_s20, %s65_s21  ;;  %p71_p10 = scmp.lt.s32.totalorder %s65_s21, %s65_s21 }
  0x17   :  { %p72_p11 = por %p71_p10, %p70_p9 }
  0x19   :  { %p73_p12 = pnand %p72_p11, %p66_p8 }
  0x85   :  { %v23_v1 = vpop.permute.xlu0 %22 }
  0x86   :  { %24 = vst [vmem:[#allocation5] sm:$0xff] %v23_v1 }
  0x87   :  { %76 = shalt.err (!%p73_p12)
}
  0x88   :  { %s77_s0 = scalar_lea.hbm %s129_s1, 128 }
  0x89   :  { %p78_p13 = scmp.ne.s32.totalorder %s129_s1, %s77_s0  ;;  %p81_p0 = scmp.lt.u32.totalorder %s77_s0, %s129_s1 }
  0x8b   :  { %p83_p1 = pnand %p81_p0, %p78_p13 }
  0x8d   :  { %86 = shalt.err (!%p83_p1)
}
  0x8e   :  { %34 = dma.vmem_to_hbm [thread:$0]  %s32_s20, 128, %s129_s1, [#allocation4]  }
  0x8f   :  { %89 = dma.done.wait [#allocation4], 128  }
  0x90   :  { %90 = vsyncadd [#allocation4], 4294967168 }
  0x91   :  { %38 = vsyncpa [#allocation3], 1 }
  0x92   :  { %39 = vsyncpa [#allocation4], 1 }

</bundles_post_ra>
